<compile_context>
chip_gen: v5e
topology: v5e:2x2
jax: 0.10.0
libtpu: 0.0.40
codegen_flags: <defaults>
</compile_context>

<pallas_src>
import functools

import jax
import jax.numpy as jnp
from jax import lax
from jax.experimental import pallas as pl
from jax.experimental.pallas import tpu as pltpu


def mlp_kernel(x_ref,
               w1_ref, b1_ref,
               w2_ref, b2_ref,
               w3_ref, b3_ref,
               w4t_ref, b4_ref,
               o_ref,
               *, chunk, n_chunks):
    # x_ref: [tb, 4]   (batch rows in sublanes, 4 features in lanes)
    # o_ref: [1, tb]   (lane-dense output slab)
    # Hoist the tiny resident weight/bias loads out of the chunk loop.
    w1 = w1_ref[...]    # [32, 4]
    b1 = b1_ref[...]    # [32, 1]
    w2 = w2_ref[...]    # [24, 32]
    b2 = b2_ref[...]    # [24, 1]
    w3 = w3_ref[...]    # [16, 24]
    b3 = b3_ref[...]    # [16, 1]
    w4t = w4t_ref[...]  # [16, 1]
    b4 = b4_ref[...]    # [1, 1]

    def chunk_body(j, carry):
        start = pl.multiple_of(j * chunk, chunk)
        xc = x_ref[pl.ds(start, chunk), :]                        # [chunk, 4]
        # Layer 1: contract the feature dim of both operands; result is lane-dense
        # [32, chunk] and no transpose of x is materialized.
        h = lax.dot_general(w1, xc, (((1,), (1,)), ((), ())),
                            preferred_element_type=jnp.float32)   # [32, chunk]
        h = jnp.maximum(h + b1, 0.0)
        h = jnp.dot(w2, h, preferred_element_type=jnp.float32)    # [24, chunk]
        h = jnp.maximum(h + b2, 0.0)
        h = jnp.dot(w3, h, preferred_element_type=jnp.float32)    # [16, chunk]
        h = jnp.maximum(h + b3, 0.0)
        # Layer 4 (16 -> 1) off the MXU: VPU multiply + 16-sublane reduce (XLU).
        o = jnp.sum(h * w4t, axis=0, keepdims=True) + b4          # [1, chunk]
        o_ref[:, pl.ds(start, chunk)] = o.astype(o_ref.dtype)
        return carry

    # Two independent chunks in flight (unroll=2) hide MXU drain latency on v5e/v6e.
    lax.fori_loop(0, n_chunks, chunk_body, 0, unroll=2)


def mlp_forward(x, params, *, tb=16384, chunk=2048):
    """x: [B, 4] float32 -> [B, 1] float32 (forward pass of MLPModel_C_Ni)."""
    (w1, b1), (w2, b2), (w3, b3), (w4, b4) = params  # w: [out, in], b: [out, 1]
    if x.ndim != 2 or x.shape[1] != 4:
        raise ValueError(f"expected x of shape [B, 4], got {x.shape}")
    assert chunk % 128 == 0, "chunk must be a multiple of 128 lanes"
    assert tb % chunk == 0, "tb must be a multiple of chunk"
    B = x.shape[0]

    # Shrink the batch tile for small batches: avoids DMA-ing a mostly-padded tile and
    # keeps the parallel grid >= 2 steps (both v7x TensorCores busy) whenever B allows.
    tb_eff = tb
    while (tb_eff // 2 >= chunk and (tb_eff // 2) % chunk == 0
           and pl.cdiv(B, tb_eff) < 2):
        tb_eff //= 2
    n_tiles = pl.cdiv(B, tb_eff)
    n_chunks = tb_eff // chunk

    w4t = w4.T  # [16, 1]: lane-broadcasts against h3 [16, chunk] in-kernel

    def resident(a):  # full-array block, same block every step -> stays in VMEM
        return pl.BlockSpec(a.shape, lambda i: (0,) * a.ndim)

    kernel = functools.partial(mlp_kernel, chunk=chunk, n_chunks=n_chunks)

    out = pl.pallas_call(
        kernel,
        out_shape=jax.ShapeDtypeStruct((1, B), jnp.float32),
        grid=(n_tiles,),
        in_specs=[
            pl.BlockSpec((tb_eff, 4), lambda i: (i, 0)),   # x tile: batch-row slice
            resident(w1), resident(b1),
            resident(w2), resident(b2),
            resident(w3), resident(b3),
            resident(w4t), resident(b4),
        ],
        out_specs=pl.BlockSpec((1, tb_eff), lambda i: (0, i)),  # lane-dense output
        compiler_params=pltpu.CompilerParams(
            dimension_semantics=("parallel",),
            vmem_limit_bytes=48 * 1024 * 1024,
        ),
    )(x, w1, b1, w2, b2, w3, b3, w4t, b4)

    return out.reshape(B, 1)  # (1, B) -> (B, 1) is a free relayout


def init_params(key):
    """Deterministic PyTorch-style init. w: [out, in] (torch layout), b: [out, 1]."""
    dims = [(4, 32), (32, 24), (24, 16), (16, 1)]
    params = []
    for i, (fan_in, fan_out) in enumerate(dims):
        kw, kb = jax.random.split(jax.random.fold_in(key, i))
        bound = 1.0 / jnp.sqrt(float(fan_in))
        w = jax.random.uniform(kw, (fan_out, fan_in), jnp.float32, -bound, bound)
        b = jax.random.uniform(kb, (fan_out, 1), jnp.float32, -bound, bound)
        params.append((w, b))
    return params


def reference_forward(x, params):
    h = x
    for i, (w, b) in enumerate(params):
        h = h @ w.T + b.T
        if i < len(params) - 1:
            h = jnp.maximum(h, 0.0)
    return h


if __name__ == "__main__":
    key = jax.random.PRNGKey(0)
    k_x, k_p = jax.random.split(key)
    params = init_params(k_p)

    # (1) Small config exercising multiple grid tiles, multiple inner chunks, the
    #     unrolled loop and a ragged final block (1200 = 2*512 + 176).
    B1 = 1200
    x1 = jax.random.normal(k_x, (B1, 4), dtype=jnp.float32)
    out1 = jax.block_until_ready(mlp_forward(x1, params, tb=512, chunk=256))
    ref1 = reference_forward(x1, params)
    assert out1.shape == (B1, 1), out1.shape
    assert jnp.allclose(out1, ref1, atol=3e-5, rtol=3e-5)

    # (2) Default (production) tiling: 2 parallel grid tiles x 8 inner chunks, ragged
    #     tail (20000 = 16384 + 3616).
    B2 = 20000
    x2 = jax.random.normal(jax.random.fold_in(k_x, 1), (B2, 4), dtype=jnp.float32)
    out2 = jax.block_until_ready(mlp_forward(x2, params))
    ref2 = reference_forward(x2, params)
    assert out2.shape == (B2, 1), out2.shape
    assert jnp.allclose(out2, ref2, atol=3e-5, rtol=3e-5)

    print("KERNEL_OK")
</pallas_src>

<mosaic_0001>
module attributes {stable_mosaic.version = 11 : i64} {
  func.func @mlp_kernel(%arg0: i32, %arg1: memref<512x4xf32, #tpu.memory_space<vmem>>, %arg2: memref<32x4xf32, #tpu.memory_space<vmem>>, %arg3: memref<32x1xf32, #tpu.memory_space<vmem>>, %arg4: memref<24x32xf32, #tpu.memory_space<vmem>>, %arg5: memref<24x1xf32, #tpu.memory_space<vmem>>, %arg6: memref<16x24xf32, #tpu.memory_space<vmem>>, %arg7: memref<16x1xf32, #tpu.memory_space<vmem>>, %arg8: memref<16x1xf32, #tpu.memory_space<vmem>>, %arg9: memref<1x1xf32, #tpu.memory_space<vmem>>, %arg10: memref<1x512xf32, #tpu.memory_space<vmem>>) attributes {dimension_semantics = [#tpu.dimension_semantics<parallel>], iteration_bounds = array<i64: 3>, scalar_prefetch = 0 : i64, scratch_operands = 0 : i64, tpu.core_type = #tpu.core_type<tc>, window_params = [{transform_indices = @transform_0, window_bounds = array<i64: 512, 4>}, {pipeline_mode = #tpu.pipeline_mode<synchronous>, transform_indices = @transform_1, window_bounds = array<i64: 32, 4>}, {pipeline_mode = #tpu.pipeline_mode<synchronous>, transform_indices = @transform_2, window_bounds = array<i64: 32, 1>}, {pipeline_mode = #tpu.pipeline_mode<synchronous>, transform_indices = @transform_3, window_bounds = array<i64: 24, 32>}, {pipeline_mode = #tpu.pipeline_mode<synchronous>, transform_indices = @transform_4, window_bounds = array<i64: 24, 1>}, {pipeline_mode = #tpu.pipeline_mode<synchronous>, transform_indices = @transform_5, window_bounds = array<i64: 16, 24>}, {pipeline_mode = #tpu.pipeline_mode<synchronous>, transform_indices = @transform_6, window_bounds = array<i64: 16, 1>}, {pipeline_mode = #tpu.pipeline_mode<synchronous>, transform_indices = @transform_7, window_bounds = array<i64: 16, 1>}, {pipeline_mode = #tpu.pipeline_mode<synchronous>, transform_indices = @transform_8, window_bounds = array<i64: 1, 1>}, {transform_indices = @transform_9, window_bounds = array<i64: 1, 512>}]} {
    %c0 = arith.constant 0 : index
    %c0_0 = arith.constant 0 : index
    %0 = vector.load %arg2[%c0, %c0_0] : memref<32x4xf32, #tpu.memory_space<vmem>>, vector<32x4xf32>
    %c0_1 = arith.constant 0 : index
    %c0_2 = arith.constant 0 : index
    %1 = vector.load %arg3[%c0_1, %c0_2] : memref<32x1xf32, #tpu.memory_space<vmem>>, vector<32x1xf32>
    %c0_3 = arith.constant 0 : index
    %c0_4 = arith.constant 0 : index
    %2 = vector.load %arg4[%c0_3, %c0_4] : memref<24x32xf32, #tpu.memory_space<vmem>>, vector<24x32xf32>
    %c0_5 = arith.constant 0 : index
    %c0_6 = arith.constant 0 : index
    %3 = vector.load %arg5[%c0_5, %c0_6] : memref<24x1xf32, #tpu.memory_space<vmem>>, vector<24x1xf32>
    %c0_7 = arith.constant 0 : index
    %c0_8 = arith.constant 0 : index
    %4 = vector.load %arg6[%c0_7, %c0_8] : memref<16x24xf32, #tpu.memory_space<vmem>>, vector<16x24xf32>
    %c0_9 = arith.constant 0 : index
    %c0_10 = arith.constant 0 : index
    %5 = vector.load %arg7[%c0_9, %c0_10] : memref<16x1xf32, #tpu.memory_space<vmem>>, vector<16x1xf32>
    %c0_11 = arith.constant 0 : index
    %c0_12 = arith.constant 0 : index
    %6 = vector.load %arg8[%c0_11, %c0_12] : memref<16x1xf32, #tpu.memory_space<vmem>>, vector<16x1xf32>
    %c0_13 = arith.constant 0 : index
    %c0_14 = arith.constant 0 : index
    %7 = vector.load %arg9[%c0_13, %c0_14] : memref<1x1xf32, #tpu.memory_space<vmem>>, vector<1x1xf32>
    %c0_i32 = arith.constant 0 : i32
    %c256_i32 = arith.constant 256 : i32
    %8 = arith.muli %c0_i32, %c256_i32 : i32
    %9 = tpu.assume_multiple %8, 256 : i32
    %10 = arith.index_cast %9 : i32 to index
    %c0_15 = arith.constant 0 : index
    %11 = vector.load %arg1[%10, %c0_15] : memref<512x4xf32, #tpu.memory_space<vmem>>, vector<256x4xf32>
    %cst = arith.constant dense<0.000000e+00> : vector<32x256xf32>
    %12 = tpu.matmul %0, %11, %cst {dimension_numbers = #tpu.dot_dimension_numbers<[1], [1], [0], [0], [0, 0, 1, 0], [], []>} : vector<32x4xf32>, vector<256x4xf32>, vector<32x256xf32> -> vector<32x256xf32>
    %13 = vector.broadcast %1 : vector<32x1xf32> to vector<32x256xf32>
    %14 = arith.addf %12, %13 : vector<32x256xf32>
    %cst_16 = arith.constant 0.000000e+00 : f32
    %15 = vector.broadcast %cst_16 : f32 to vector<32x256xf32>
    %16 = arith.maximumf %14, %15 : vector<32x256xf32>
    %cst_17 = arith.constant dense<0.000000e+00> : vector<24x256xf32>
    %17 = tpu.matmul %2, %16, %cst_17 {dimension_numbers = #tpu.dot_dimension_numbers<[1], [0], [0], [1], [0, 0, 1, 1], [], []>} : vector<24x32xf32>, vector<32x256xf32>, vector<24x256xf32> -> vector<24x256xf32>
    %18 = vector.broadcast %3 : vector<24x1xf32> to vector<24x256xf32>
    %19 = arith.addf %17, %18 : vector<24x256xf32>
    %cst_18 = arith.constant 0.000000e+00 : f32
    %20 = vector.broadcast %cst_18 : f32 to vector<24x256xf32>
    %21 = arith.maximumf %19, %20 : vector<24x256xf32>
    %cst_19 = arith.constant dense<0.000000e+00> : vector<16x256xf32>
    %22 = tpu.matmul %4, %21, %cst_19 {dimension_numbers = #tpu.dot_dimension_numbers<[1], [0], [0], [1], [0, 0, 1, 1], [], []>} : vector<16x24xf32>, vector<24x256xf32>, vector<16x256xf32> -> vector<16x256xf32>
    %23 = vector.broadcast %5 : vector<16x1xf32> to vector<16x256xf32>
    %24 = arith.addf %22, %23 : vector<16x256xf32>
    %cst_20 = arith.constant 0.000000e+00 : f32
    %25 = vector.broadcast %cst_20 : f32 to vector<16x256xf32>
    %26 = arith.maximumf %24, %25 : vector<16x256xf32>
    %27 = vector.broadcast %6 : vector<16x1xf32> to vector<16x256xf32>
    %28 = arith.mulf %26, %27 : vector<16x256xf32>
    %cst_21 = arith.constant dense<0.000000e+00> : vector<256xf32>
    %29 = vector.multi_reduction <add>, %28, %cst_21 [0] : vector<16x256xf32> to vector<256xf32>
    %30 = vector.shape_cast %29 : vector<256xf32> to vector<1x256xf32>
    %31 = vector.broadcast %7 : vector<1x1xf32> to vector<1x256xf32>
    %32 = arith.addf %30, %31 : vector<1x256xf32>
    %c0_22 = arith.constant 0 : index
    %33 = arith.index_cast %9 : i32 to index
    %34 = vector.load %arg10[%c0_22, %33] : memref<1x512xf32, #tpu.memory_space<vmem>>, vector<1x256xf32>
    tpu.vector_store %arg10[%c0_22, %33], %32 {strides = array<i32>} : memref<1x512xf32, #tpu.memory_space<vmem>>, vector<1x256xf32>,
    %c1_i32 = arith.constant 1 : i32
    %c256_i32_23 = arith.constant 256 : i32
    %35 = arith.muli %c1_i32, %c256_i32_23 : i32
    %36 = tpu.assume_multiple %35, 256 : i32
    %37 = arith.index_cast %36 : i32 to index
    %c0_24 = arith.constant 0 : index
    %38 = vector.load %arg1[%37, %c0_24] : memref<512x4xf32, #tpu.memory_space<vmem>>, vector<256x4xf32>
    %cst_25 = arith.constant dense<0.000000e+00> : vector<32x256xf32>
    %39 = tpu.matmul %0, %38, %cst_25 {dimension_numbers = #tpu.dot_dimension_numbers<[1], [1], [0], [0], [0, 0, 1, 0], [], []>} : vector<32x4xf32>, vector<256x4xf32>, vector<32x256xf32> -> vector<32x256xf32>
    %40 = vector.broadcast %1 : vector<32x1xf32> to vector<32x256xf32>
    %41 = arith.addf %39, %40 : vector<32x256xf32>
    %cst_26 = arith.constant 0.000000e+00 : f32
    %42 = vector.broadcast %cst_26 : f32 to vector<32x256xf32>
    %43 = arith.maximumf %41, %42 : vector<32x256xf32>
    %cst_27 = arith.constant dense<0.000000e+00> : vector<24x256xf32>
    %44 = tpu.matmul %2, %43, %cst_27 {dimension_numbers = #tpu.dot_dimension_numbers<[1], [0], [0], [1], [0, 0, 1, 1], [], []>} : vector<24x32xf32>, vector<32x256xf32>, vector<24x256xf32> -> vector<24x256xf32>
    %45 = vector.broadcast %3 : vector<24x1xf32> to vector<24x256xf32>
    %46 = arith.addf %44, %45 : vector<24x256xf32>
    %cst_28 = arith.constant 0.000000e+00 : f32
    %47 = vector.broadcast %cst_28 : f32 to vector<24x256xf32>
    %48 = arith.maximumf %46, %47 : vector<24x256xf32>
    %cst_29 = arith.constant dense<0.000000e+00> : vector<16x256xf32>
    %49 = tpu.matmul %4, %48, %cst_29 {dimension_numbers = #tpu.dot_dimension_numbers<[1], [0], [0], [1], [0, 0, 1, 1], [], []>} : vector<16x24xf32>, vector<24x256xf32>, vector<16x256xf32> -> vector<16x256xf32>
    %50 = vector.broadcast %5 : vector<16x1xf32> to vector<16x256xf32>
    %51 = arith.addf %49, %50 : vector<16x256xf32>
    %cst_30 = arith.constant 0.000000e+00 : f32
    %52 = vector.broadcast %cst_30 : f32 to vector<16x256xf32>
    %53 = arith.maximumf %51, %52 : vector<16x256xf32>
    %54 = vector.broadcast %6 : vector<16x1xf32> to vector<16x256xf32>
    %55 = arith.mulf %53, %54 : vector<16x256xf32>
    %cst_31 = arith.constant dense<0.000000e+00> : vector<256xf32>
    %56 = vector.multi_reduction <add>, %55, %cst_31 [0] : vector<16x256xf32> to vector<256xf32>
    %57 = vector.shape_cast %56 : vector<256xf32> to vector<1x256xf32>
    %58 = vector.broadcast %7 : vector<1x1xf32> to vector<1x256xf32>
    %59 = arith.addf %57, %58 : vector<1x256xf32>
    %c0_32 = arith.constant 0 : index
    %60 = arith.index_cast %36 : i32 to index
    %61 = vector.load %arg10[%c0_32, %60] : memref<1x512xf32, #tpu.memory_space<vmem>>, vector<1x256xf32>
    tpu.vector_store %arg10[%c0_32, %60], %59 {strides = array<i32>} : memref<1x512xf32, #tpu.memory_space<vmem>>, vector<1x256xf32>,
    %c2_i32 = arith.constant 2 : i32
    return
  }
  func.func @transform_0(%arg0: i32) -> (i32, i32) {
    %c0_i32 = arith.constant 0 : i32
    %c0_i32_0 = arith.constant 0 : i32
    return %arg0, %c0_i32 : i32, i32
  }
  func.func @transform_1(%arg0: i32) -> (i32, i32) {
    %c0_i32 = arith.constant 0 : i32
    %c0_i32_0 = arith.constant 0 : i32
    %c0_i32_1 = arith.constant 0 : i32
    return %c0_i32, %c0_i32_0 : i32, i32
  }
  func.func @transform_2(%arg0: i32) -> (i32, i32) {
    %c0_i32 = arith.constant 0 : i32
    %c0_i32_0 = arith.constant 0 : i32
    %c0_i32_1 = arith.constant 0 : i32
    return %c0_i32, %c0_i32_0 : i32, i32
  }
  func.func @transform_3(%arg0: i32) -> (i32, i32) {
    %c0_i32 = arith.constant 0 : i32
    %c0_i32_0 = arith.constant 0 : i32
    %c0_i32_1 = arith.constant 0 : i32
    return %c0_i32, %c0_i32_0 : i32, i32
  }
  func.func @transform_4(%arg0: i32) -> (i32, i32) {
    %c0_i32 = arith.constant 0 : i32
    %c0_i32_0 = arith.constant 0 : i32
    %c0_i32_1 = arith.constant 0 : i32
    return %c0_i32, %c0_i32_0 : i32, i32
  }
  func.func @transform_5(%arg0: i32) -> (i32, i32) {
    %c0_i32 = arith.constant 0 : i32
    %c0_i32_0 = arith.constant 0 : i32
    %c0_i32_1 = arith.constant 0 : i32
    return %c0_i32, %c0_i32_0 : i32, i32
  }
  func.func @transform_6(%arg0: i32) -> (i32, i32) {
    %c0_i32 = arith.constant 0 : i32
    %c0_i32_0 = arith.constant 0 : i32
    %c0_i32_1 = arith.constant 0 : i32
    return %c0_i32, %c0_i32_0 : i32, i32
  }
  func.func @transform_7(%arg0: i32) -> (i32, i32) {
    %c0_i32 = arith.constant 0 : i32
    %c0_i32_0 = arith.constant 0 : i32
    %c0_i32_1 = arith.constant 0 : i32
    return %c0_i32, %c0_i32_0 : i32, i32
  }
  func.func @transform_8(%arg0: i32) -> (i32, i32) {
    %c0_i32 = arith.constant 0 : i32
    %c0_i32_0 = arith.constant 0 : i32
    %c0_i32_1 = arith.constant 0 : i32
    return %c0_i32, %c0_i32_0 : i32, i32
  }
  func.func @transform_9(%arg0: i32) -> (i32, i32) {
    %c0_i32 = arith.constant 0 : i32
    %c0_i32_0 = arith.constant 0 : i32
    return %c0_i32, %arg0 : i32, i32
  }
}

</mosaic_0001>

<bundles_post_ra>
// kernel: tpu_custom_call.1
= control target key start
LH: loop header
LB: loop body
LE: loop exit
PB: predicated region body
PF: predicated region fallthrough
CT: control target
= control target key end

     0   :  { %s2007_s0 = inlined_call_operand.vmem [shape: f32[1200,4], index: 0, kind: input, shape index: {}]   ;;  %s2008_s1 = inlined_call_operand.vmem [shape: f32[32,4], index: 1, kind: input, shape index: {}]   ;;  %s2009_s2 = inlined_call_operand.vmem [shape: f32[32,1], index: 2, kind: input, shape index: {}]   ;;  %s2010_s3 = inlined_call_operand.vmem [shape: f32[24,32], index: 3, kind: input, shape index: {}]   ;;  %s2011_s4 = inlined_call_operand.vmem [shape: f32[24,1], index: 4, kind: input, shape index: {}]   ;;  %s2012_s5 = inlined_call_operand.vmem [shape: f32[16,24], index: 5, kind: input, shape index: {}]   ;;  %s2013_s6 = inlined_call_operand.vmem [shape: f32[16,1], index: 6, kind: input, shape index: {}]   ;;  %s2014_s7 = inlined_call_operand.vmem [shape: f32[16,1], index: 7, kind: input, shape index: {}]   ;;  %s2015_s8 = inlined_call_operand.<no memory space> [shape: f32[1,1], index: 8, kind: input, shape index: {}]   ;;  %s2016_s9 = inlined_call_operand.hbm [shape: f32[1,1200], index: 9, kind: output, shape index: {}]  }
   0x1   :  { %v14_v0 = vstv %s2015_s8 }
   0x2   :  { %15 = vst [vmem:[#allocation2] sm:$0x1] %v14_v0 }
   0x3   :  { %16 = vsyncpa [#allocation4], 0 }
   0x4   :  { %18 = vsyncpa [#allocation4 + $0x1], 0  ;;  %s1531_s11 = smov 0   ;;  %s1533_s12 = smov 0  }
   0x5   :  { %s1535_s13 = smov 0   ;;  %s1537_s14 = smov 0  }
   0x6 LB: > { %s1552_s8 = sadd.s32 4294967295, %s1474_s14   ;;  %s1214_s15 = sadd.s32 4294967294, %s1474_s14   ;;  %s1474_s14 = sphi %s1537_s14, %s2026_s14   ;;  %s1470_s13 = sphi %s1535_s13, %s2025_s13   ;;  %s1466_s12 = sphi %s1533_s12, %s2024_s12   ;;  %s1462_s11 = sphi %s1531_s11, %s2023_s11  }
   0x7   : > { %s1556_s16 = sadd.s32 1, %s1474_s14   ;;  %s225_s17 = sadd.s32 1, %s1470_s13 }
   0x8   : > { %s222_s18 = ssub.s32 %s1474_s14, %s1556_s16  ;;  %p235_p0 = scmp.ne.s32.totalorder %s1470_s13, %s1466_s12 }
   0x9   : > { %p223_p1 = scmp.eq.s32.totalorder %s222_s18, 0  ;;  %p236_p2 = scmp.eq.s32.totalorder %s1552_s8, 2 }
   0xa   : > { %p241_p3 = scmp.ne.s32.totalorder %s1466_s12, %s1462_s11  ;;  %p242_p4 = scmp.eq.s32.totalorder %s1214_s15, 2 }
   0xb   : > { %s1567_s19 = scalar_select %p223_p1, %s1470_s13, %s225_s17  }
   0xc   : > { %p1569_p5 = por %p236_p2, %p235_p0  ;;  %p1573_p6 = por %p242_p4, %p241_p3 }
   0xd   : > { %p1217_p7 = scmp.ge.s32.totalorder %s1474_s14, 1  ;;  %p301_p8 = scmp.lt.s32.totalorder %s1474_s14, 4 }
   0xf   : > { %p302_p9 = pnand %p1217_p7, %p301_p8 }
  0x10   : > { %s1219_s22 = sshll.u32 (!%p302_p9), %s1552_s8, 6  ;;  %s338_s10 = sand.u32 (!%p302_p9), 1, %s1466_s12  }
  0x11   : > { %305 = sbr.rel (%p302_p9) target bundleno = 980 (0x3d4), region = 56  ;;  %p346_p10 = scmp.lt.s32.totalorder (!%p302_p9), %s1219_s22, 149 }
  0x12   : > { %s1954_s17 = scalar_lea.sflag (!%p302_p9), [#allocation4], %s338_s10 }
  0x16   : > { %s2028_s22 = smov (!%p346_p10, %s1219_s22), 149  ;;  %vm432_vm0 = vcmask 31744   ;;  %v364_v19 = vld [vmem:[%s2009_s2 + $0x8] sm:$0xff]  ;;  %v366_v20 = vld [vmem:[%s2009_s2 + $0x18] sm:$0xff]  ;;  %v1476_v23 = vmov 0   ;;  %v363_v26 = vld [vmem:[%s2009_s2] sm:$0xff] }
  0x17   : > { %s1220_s23 = sshll.u32 %s2028_s22, 3  ;;  %1399 = vset.pattern.permute.xlu1 %v1476_v23  ;;  %1398 = vset.pattern.permute.xlu0 %v1476_v23  ;;  %v365_v27 = vld [vmem:[%s2009_s2 + $0x10] sm:$0xff]  ;;  %v370_v32 = vld [vmem:[%s2011_s4] sm:$0xff]  ;;  %v378_v42 = vld [vmem:[%s2014_s7 + $0x8] sm:$0xff]  ;;  %vm622_vm1 = vcmask 261120   ;;  %vm700_vm2 = vcmask 195584  }
  0x18   : > { %s1583_s26 = scalar_lea.vmem %s2007_s0, %s1220_s23  ;;  %419 = vperm.xlu1 %1399, %v364_v19   ;;  %429 = vperm.xlu0 %1398, %v366_v20   ;;  %v375_v37 = vld [vmem:[%s2013_s6] sm:$0xff]  ;;  %v1685_v43 = vld [vmem:[%s2008_s1 + $0x8] sm:$0xff]  ;;  %v1694_v44 = vld [vmem:[%s2008_s1 + $0x10] sm:$0xff]  ;;  %vm796_vm3 = vcmask 1040384   ;;  %s1355_s18 = sshll.u32 (%p1569_p5), %s1552_s8, 2 }
  0x19   : > { %v395_v1 = vld [vmem:[%s1583_s26 + $0x78] sm:$0xff]  ;;  %v394_v3 = vld [vmem:[%s1583_s26 + $0x70] sm:$0xff]  ;;  %v393_v5 = vld [vmem:[%s1583_s26 + $0x68] sm:$0xff]  ;;  %1400 = vset.pattern.permute.xlu2 %v1476_v23  ;;  %s1143_s22 = ssub.s32 (%p1569_p5), 10, %s1355_s18 }
  0x1a   : > { %v411_v2 = vld [vmem:[%s1583_s26 + $0xf8] sm:$0xff]  ;;  %1221 = vmatpush.xpose.msk.msra.mxu0 %vm432_vm0, %v395_v1  ;;  %v410_v4 = vld [vmem:[%s1583_s26 + $0xf0] sm:$0xff]  ;;  %v409_v6 = vld [vmem:[%s1583_s26 + $0xe8] sm:$0xff]  ;;  %p1144_p11 = scmp.lt.s32.totalorder (%p1569_p5), %s1143_s22, 4 }
  0x1b   : > { %1241 = vmatpush.xpose.msk.msra.mxu1 %vm432_vm0, %v411_v2  ;;  %v392_v7 = vld [vmem:[%s1583_s26 + $0x60] sm:$0xff]  ;;  %v391_v9 = vld [vmem:[%s1583_s26 + $0x58] sm:$0xff]  ;;  %v390_v11 = vld [vmem:[%s1583_s26 + $0x50] sm:$0xff] }
  0x1c   : > { %v408_v8 = vld [vmem:[%s1583_s26 + $0xe0] sm:$0xff]  ;;  %v407_v10 = vld [vmem:[%s1583_s26 + $0xd8] sm:$0xff]  ;;  %v406_v12 = vld [vmem:[%s1583_s26 + $0xd0] sm:$0xff] }
  0x1d   : > { %v389_v13 = vld [vmem:[%s1583_s26 + $0x48] sm:$0xff]  ;;  %v388_v15 = vld [vmem:[%s1583_s26 + $0x40] sm:$0xff]  ;;  %v387_v17 = vld [vmem:[%s1583_s26 + $0x38] sm:$0xff] }
  0x1e   : > { %1222 = vmatpush.xpose.msk.msra.mxu0 %vm432_vm0, %v394_v3  ;;  %v405_v14 = vld [vmem:[%s1583_s26 + $0xc8] sm:$0xff]  ;;  %v404_v16 = vld [vmem:[%s1583_s26 + $0xc0] sm:$0xff]  ;;  %v403_v18 = vld [vmem:[%s1583_s26 + $0xb8] sm:$0xff] }
  0x1f   : > { %1242 = vmatpush.xpose.msk.msra.mxu1 %vm432_vm0, %v410_v4  ;;  %v386_v21 = vld [vmem:[%s1583_s26 + $0x30] sm:$0xff]  ;;  %v385_v24 = vld [vmem:[%s1583_s26 + $0x28] sm:$0xff]  ;;  %v384_v28 = vld [vmem:[%s1583_s26 + $0x20] sm:$0xff] }
  0x20   : > { %v402_v22 = vld [vmem:[%s1583_s26 + $0xb0] sm:$0xff]  ;;  %v401_v25 = vld [vmem:[%s1583_s26 + $0xa8] sm:$0xff]  ;;  %v400_v29 = vld [vmem:[%s1583_s26 + $0xa0] sm:$0xff]  ;;  %414 = vperm.xlu1 %1399, %v363_v26   ;;  %424 = vperm.xlu0 %1398, %v365_v27  }
  0x21   : > { %v383_v30 = vld [vmem:[%s1583_s26 + $0x18] sm:$0xff]  ;;  %v382_v33 = vld [vmem:[%s1583_s26 + $0x10] sm:$0xff]  ;;  %v381_v35 = vld [vmem:[%s1583_s26 + $0x8] sm:$0xff] }
  0x22   : > { %1223 = vmatpush.xpose.msk.msra.mxu0 %vm432_vm0, %v393_v5  ;;  %v399_v31 = vld [vmem:[%s1583_s26 + $0x98] sm:$0xff]  ;;  %v398_v34 = vld [vmem:[%s1583_s26 + $0x90] sm:$0xff]  ;;  %v397_v36 = vld [vmem:[%s1583_s26 + $0x88] sm:$0xff] }
  0x23   : > { %1243 = vmatpush.xpose.msk.msra.mxu1 %vm432_vm0, %v409_v6  ;;  %v377_v38 = vld [vmem:[%s2014_s7] sm:$0xff]  ;;  %v1703_v45 = vld [vmem:[%s2008_s1 + $0x18] sm:$0xff]  ;;  %v372_v54 = vld [vmem:[%s2011_s4 + $0x10] sm:$0xff] }
  0x24   : > { %v380_v39 = vld [vmem:[%s1583_s26] sm:$0xff]  ;;  %619 = vperm.xlu2 %1400, %v372_v54   ;;  %v371_v3 = vld [vmem:[%s2011_s4 + $0x8] sm:$0xff]  ;;  %v1282_v54 = vld [vmem:[%s1583_s26 + $0x158] sm:$0xff] }
  0x25   : > { %v396_v40 = vld [vmem:[%s1583_s26 + $0x80] sm:$0xff] }
  0x26   : > { %1224 = vmatpush.xpose.msk.msra.mxu0 %vm432_vm0, %v392_v7  ;;  %v1673_v41 = vld [vmem:[%s2008_s1] sm:$0xff] }
  0x27   : > { %1244 = vmatpush.xpose.msk.msra.mxu1 %vm432_vm0, %v408_v8 }
  0x28   : > { %609 = vperm.xlu0 %1398, %v370_v32   ;;  %692 = vperm.xlu1 %1399, %v375_v37  }
  0x2a   : > { %1225 = vmatpush.xpose.msk.msra.mxu0 %vm432_vm0, %v391_v9 }
  0x2b   : > { %1245 = vmatpush.xpose.msk.msra.mxu1 %vm432_vm0, %v407_v10 }
  0x2c   : > { %614 = vperm.xlu2 %1400, %v371_v3   ;;  %v1293_v3 = vld [vmem:[%s1583_s26 + $0x1b0] sm:$0xff] }
  0x2e   : > { %1226 = vmatpush.xpose.msk.msra.mxu0 %vm432_vm0, %v390_v11 }
  0x2f   : > { %1246 = vmatpush.xpose.msk.msra.mxu1 %vm432_vm0, %v406_v12  ;;  %v1734_v12 = vld [vmem:[%s2010_s3] sm:$0xff] }
  0x30   : > { %759 = vperm.xlu0 %1398, %v377_v38   ;;  %764 = vperm.xlu1 %1399, %v378_v42   ;;  %v1776_v38 = vld [vmem:[%s2012_s5] sm:$0xff]  ;;  %v1285_v42 = vld [vmem:[%s1583_s26 + $0x170] sm:$0xff] }
  0x32   : > { %1227 = vmatpush.xpose.msk.msra.mxu0 %vm432_vm0, %v389_v13  ;;  %v376_v13 = vld [vmem:[%s2013_s6 + $0x8] sm:$0xff] }
  0x33   : > { %1247 = vmatpush.xpose.msk.msra.mxu1 %vm432_vm0, %v405_v14  ;;  %v1746_v14 = vld [vmem:[%s2010_s3 + $0x8] sm:$0xff] }
  0x34   : > { %697 = vperm.xlu2 %1400, %v376_v13   ;;  %v1272_v13 = vld [vmem:[%s1583_s26 + $0x108] sm:$0xff] }
  0x36   : > { %1228 = vmatpush.xpose.msk.msra.mxu0 %vm432_vm0, %v388_v15  ;;  %v379_v15 = vld [vmem:[#allocation2] sm:$0x1] }
  0x37   : > { %1248 = vmatpush.xpose.msk.msra.mxu1 %vm432_vm0, %v404_v16  ;;  %v1755_v16 = vld [vmem:[%s2010_s3 + $0x10] sm:$0xff] }
  0x3a   : > { %1229 = vmatpush.xpose.msk.msra.mxu0 %vm432_vm0, %v387_v17 }
  0x3b   : > { %1249 = vmatpush.xpose.msk.msra.mxu1 %vm432_vm0, %v403_v18 }
  0x3c   : > { %787 = vperm.xlu2 %1400, %v379_v15   ;;  %v1288_v15 = vld [vmem:[%s1583_s26 + $0x188] sm:$0xff] }
  0x3e   : > { %1230 = vmatpush.xpose.msk.msra.mxu0 %vm432_vm0, %v386_v21 }
  0x3f   : > { %1250 = vmatpush.xpose.msk.msra.mxu1 %vm432_vm0, %v402_v22 }
  0x42   : > { %1231 = vmatpush.xpose.msk.msra.mxu0 %vm432_vm0, %v385_v24 }
  0x43   : > { %1251 = vmatpush.xpose.msk.msra.mxu1 %vm432_vm0, %v401_v25 }
  0x46   : > { %1232 = vmatpush.xpose.msk.msra.mxu0 %vm432_vm0, %v384_v28 }
  0x47   : > { %1252 = vmatpush.xpose.msk.msra.mxu1 %vm432_vm0, %v400_v29 }
  0x4a   : > { %1233 = vmatpush.xpose.msk.msra.mxu0 %vm432_vm0, %v383_v30 }
  0x4b   : > { %1253 = vmatpush.xpose.msk.msra.mxu1 %vm432_vm0, %v399_v31 }
  0x4e   : > { %1234 = vmatpush.xpose.msk.msra.mxu0 %vm432_vm0, %v382_v33 }
  0x4f   : > { %1254 = vmatpush.xpose.msk.msra.mxu1 %vm432_vm0, %v398_v34 }
  0x52   : > { %1235 = vmatpush.xpose.msk.msra.mxu0 %vm432_vm0, %v381_v35 }
  0x53   : > { %1255 = vmatpush.xpose.msk.msra.mxu1 %vm432_vm0, %v397_v36 }
  0x56   : > { %1236 = vmatpush.xpose.msk.msra.mxu0 %vm432_vm0, %v380_v39  ;;  %v1286_v39 = vld [vmem:[%s1583_s26 + $0x178] sm:$0xff] }
  0x57   : > { %1256 = vmatpush.xpose.msk.msra.mxu1 %vm432_vm0, %v396_v40  ;;  %v1302_v40 = vld [vmem:[%s1583_s26 + $0x1f8] sm:$0xff] }
  0x59   : > { %1237 = vmatmul.msk.f32.vlgmr.msra.gmra.mxu0 %vm432_vm0, %v1673_v41 }
  0x5a   : > { %1257 = vmatmul.msk.f32.vlgmr.msra.gmra.mxu1 %vm432_vm0, %v1673_v41 }
  0x61   : > { %1238 = vmatmul.msk.f32.gmra.mxu0 %vm432_vm0, %v1685_v43 }
  0x62   : > { %1258 = vmatmul.msk.f32.gmra.mxu1 %vm432_vm0, %v1685_v43 }
  0x69   : > { %1239 = vmatmul.msk.f32.gmra.mxu0 %vm432_vm0, %v1694_v44 }
  0x6a   : > { %1259 = vmatmul.msk.f32.gmra.mxu1 %vm432_vm0, %v1694_v44 }
  0x71   : > { %1240 = vmatmul.msk.f32.gmra.mxu0 %vm432_vm0, %v1703_v45 }
  0x72   : > { %1260 = vmatmul.msk.f32.gmra.mxu1 %vm432_vm0, %v1703_v45 }
  0x7e   : > { %v1761_v19 = vpop.permute.xlu2 %619 }
  0x86   : > { %v1763_v22 = vpop.permute.xlu2 %614 }
  0x8a   : > { %v1709_v50 = vpop.permute.xlu0 %429  ;;  %v1711_v51 = vpop.permute.xlu1 %419 }
  0x92   : > { %v1716_v55 = vpop.permute.xlu0 %424  ;;  %v1722_v62 = vpop.permute.xlu1 %414 }
  0x9a   : > { %v1769_v29 = vpop.permute.xlu0 %609 }
  0xd6   : > { %v558_v46 = vpop.f32.mrf.mxu0 }
  0xd7   : > { %v587_v47 = vpop.f32.mrf.mxu1  ;;  %v559_v4 = vadd.f32 %v558_v46, %v1722_v62  ;;  %v1301_v46 = vld [vmem:[%s1583_s26 + $0x1f0] sm:$0xff] }
  0xd8   : > { %v588_v5 = vadd.f32 %v587_v47, %v1722_v62  ;;  %v1793_v47 = vld [vmem:[%s2012_s5 + $0x8] sm:$0xff] }
  0xd9   : > { %v599_v10 = vmax.f32 %v559_v4, 0.0  ;;  %v1276_v4 = vld [vmem:[%s1583_s26 + $0x128] sm:$0xff] }
  0xda   : > { %v600_v11 = vmax.f32 %v588_v5, 0.0  ;;  %v1292_v5 = vld [vmem:[%s1583_s26 + $0x1a8] sm:$0xff] }
  0xde   : > { %v561_v48 = vpop.f32.mrf.mxu0 }
  0xdf   : > { %v590_v49 = vpop.f32.mrf.mxu1  ;;  %v562_v63 = vadd.f32 %v561_v48, %v1711_v51  ;;  %v1284_v48 = vld [vmem:[%s1583_s26 + $0x168] sm:$0xff] }
  0xe0   : > { %v591_v0 = vadd.f32 %v590_v49, %v1711_v51  ;;  %v1300_v49 = vld [vmem:[%s1583_s26 + $0x1e8] sm:$0xff] }
  0xe1   : > { %v601_v8 = vmax.f32 %v562_v63, 0.0  ;;  %v1295_v63 = vld [vmem:[%s1583_s26 + $0x1c0] sm:$0xff] }
  0xe2   : > { %v602_v9 = vmax.f32 %v591_v0, 0.0  ;;  %v1278_v0 = vld [vmem:[%s1583_s26 + $0x138] sm:$0xff] }
  0xe6   : > { %v564_v52 = vpop.f32.mrf.mxu0 }
  0xe7   : > { %v593_v53 = vpop.f32.mrf.mxu1  ;;  %v565_v58 = vadd.f32 %v564_v52, %v1716_v55  ;;  %v1283_v52 = vld [vmem:[%s1583_s26 + $0x160] sm:$0xff] }
  0xe8   : > { %v594_v59 = vadd.f32 %v593_v53, %v1716_v55  ;;  %v1299_v53 = vld [vmem:[%s1583_s26 + $0x1e0] sm:$0xff] }
  0xe9   : > { %v603_v6 = vmax.f32 %v565_v58, 0.0  ;;  %v1297_v58 = vld [vmem:[%s1583_s26 + $0x1d0] sm:$0xff] }
  0xea   : > { %v604_v7 = vmax.f32 %v594_v59, 0.0  ;;  %v1280_v59 = vld [vmem:[%s1583_s26 + $0x148] sm:$0xff] }
  0xee   : > { %v567_v56 = vpop.f32.mrf.mxu0 }
  0xef   : > { %v596_v57 = vpop.f32.mrf.mxu1  ;;  %v568_v60 = vadd.f32 %v567_v56, %v1709_v50  ;;  %v1298_v56 = vld [vmem:[%s1583_s26 + $0x1d8] sm:$0xff] }
  0xf0   : > { %v597_v61 = vadd.f32 %v596_v57, %v1709_v50  ;;  %v1281_v57 = vld [vmem:[%s1583_s26 + $0x150] sm:$0xff] }
  0xf1   : > { %v605_v1 = vmax.f32 %v568_v60, 0.0  ;;  %v1296_v60 = vld [vmem:[%s1583_s26 + $0x1c8] sm:$0xff] }
  0xf2   : > { %v606_v2 = vmax.f32 %v597_v61, 0.0  ;;  %v1279_v61 = vld [vmem:[%s1583_s26 + $0x140] sm:$0xff] }
  0xf3   : > { %644 = vmatpush.msra.mxu2 %v605_v1  ;;  %v1294_v1 = vld [vmem:[%s1583_s26 + $0x1b8] sm:$0xff] }
  0xf4   : > { %670 = vmatpush.msra.mxu3 %v606_v2  ;;  %v1277_v2 = vld [vmem:[%s1583_s26 + $0x130] sm:$0xff] }
  0xf5   : > { %645 = vmatpush.msra.mxu2 %v603_v6  ;;  %v1275_v6 = vld [vmem:[%s1583_s26 + $0x120] sm:$0xff] }
  0xf6   : > { %671 = vmatpush.msra.mxu3 %v604_v7  ;;  %v1291_v7 = vld [vmem:[%s1583_s26 + $0x1a0] sm:$0xff] }
  0xf7   : > { %646 = vmatpush.msra.mxu2 %v601_v8  ;;  %v1274_v8 = vld [vmem:[%s1583_s26 + $0x118] sm:$0xff] }
  0xf8   : > { %672 = vmatpush.msra.mxu3 %v602_v9  ;;  %v1290_v9 = vld [vmem:[%s1583_s26 + $0x198] sm:$0xff] }
  0xf9   : > { %647 = vmatpush.msra.mxu2 %v599_v10  ;;  %v1273_v10 = vld [vmem:[%s1583_s26 + $0x110] sm:$0xff] }
  0xfa   : > { %673 = vmatpush.msra.mxu3 %v600_v11  ;;  %1261 = vmatmul.msk.f32.vlgmr.msra.gmra.mxu2 %vm622_vm1, %v1734_v12  ;;  %v1289_v11 = vld [vmem:[%s1583_s26 + $0x190] sm:$0xff] }
  0xfb   : > { %1264 = vmatmul.msk.f32.vlgmr.msra.gmra.mxu3 %vm622_vm1, %v1734_v12 }
 0x102   : > { %1262 = vmatmul.msk.f32.gmra.mxu2 %vm622_vm1, %v1746_v14 }
 0x103   : > { %1265 = vmatmul.msk.f32.gmra.mxu3 %vm622_vm1, %v1746_v14 }
 0x10a   : > { %1263 = vmatmul.msk.f32.gmra.mxu2 %vm622_vm1, %v1755_v16 }
 0x10b   : > { %1266 = vmatmul.msk.f32.gmra.mxu3 %vm622_vm1, %v1755_v16 }
 0x17d   : > { %v649_v17 = vpop.f32.mrf.mxu2 }
 0x17e   : > { %v675_v18 = vpop.f32.mrf.mxu3  ;;  %v650_v30 = vadd.f32 %v649_v17, %v1769_v29  ;;  %v1271_v17 = vld [vmem:[%s1583_s26 + $0x100] sm:$0xff] }
 0x17f   : > { %v676_v31 = vadd.f32 %v675_v18, %v1769_v29  ;;  %v1287_v18 = vld [vmem:[%s1583_s26 + $0x180] sm:$0xff]  ;;  %s1218_s26 = sshll.u32 %s338_s10, 2 }
 0x180   : > { %v684_v36 = vmax.f32 %v650_v30, 0.0  ;;  %s1899_s15 = scalar_lea.vmem [#allocation3], %s1218_s26 }
 0x181   : > { %v685_v37 = vmax.f32 %v676_v31, 0.0 }
 0x185   : > { %v652_v20 = vpop.f32.mrf.mxu2 }
 0x186   : > { %v678_v21 = vpop.f32.mrf.mxu3  ;;  %v653_v25 = vadd.f32 %v652_v20, %v1763_v22 }
 0x187   : > { %v679_v26 = vadd.f32 %v678_v21, %v1763_v22  ;;  %v1872_v21 = vpop.permute.xlu1 %692 }
 0x188   : > { %v686_v34 = vmax.f32 %v653_v25, 0.0 }
 0x189   : > { %v687_v35 = vmax.f32 %v679_v26, 0.0 }
 0x18d   : > { %v655_v23 = vpop.f32.mrf.mxu2 }
 0x18e   : > { %v681_v24 = vpop.f32.mrf.mxu3  ;;  %v656_v27 = vadd.f32 %v655_v23, %v1761_v19 }
 0x18f   : > { %v682_v28 = vadd.f32 %v681_v24, %v1761_v19  ;;  %v1876_v24 = vpop.permute.xlu2 %697 }
 0x190   : > { %v688_v32 = vmax.f32 %v656_v27, 0.0 }
 0x191   : > { %v689_v33 = vmax.f32 %v682_v28, 0.0 }
 0x192   : > { %720 = vmatpush.msrb.mxu2 %v688_v32  ;;  %v1880_v32 = vpop.permute.xlu0 %759 }
 0x193   : > { %743 = vmatpush.msrb.mxu3 %v689_v33  ;;  %v1882_v33 = vpop.permute.xlu1 %764 }
 0x194   : > { %721 = vmatpush.msrb.mxu2 %v686_v34 }
 0x195   : > { %744 = vmatpush.msrb.mxu3 %v687_v35 }
 0x196   : > { %722 = vmatpush.msrb.mxu2 %v684_v36 }
 0x197   : > { %745 = vmatpush.msrb.mxu3 %v685_v37  ;;  %1267 = vmatmul.msk.f32.vlgmr.msrb.gmra.mxu2 %vm700_vm2, %v1776_v38 }
 0x198   : > { %1269 = vmatmul.msk.f32.vlgmr.msrb.gmra.mxu3 %vm700_vm2, %v1776_v38  ;;  %1303 = vmatpush.xpose.msk.msra.mxu2 %vm432_vm0, %v1286_v39 }
 0x199   : > { %1323 = vmatpush.xpose.msk.msra.mxu3 %vm432_vm0, %v1302_v40 }
 0x19c   : > { %1304 = vmatpush.xpose.msk.msra.mxu2 %vm432_vm0, %v1285_v42 }
 0x19d   : > { %1324 = vmatpush.xpose.msk.msra.mxu3 %vm432_vm0, %v1301_v46 }
 0x19f   : > { %1268 = vmatmul.msk.f32.gmra.mxu2 %vm700_vm2, %v1793_v47 }
 0x1a0   : > { %1270 = vmatmul.msk.f32.gmra.mxu3 %vm700_vm2, %v1793_v47  ;;  %1305 = vmatpush.xpose.msk.msra.mxu2 %vm432_vm0, %v1284_v48 }
 0x1a1   : > { %1325 = vmatpush.xpose.msk.msra.mxu3 %vm432_vm0, %v1300_v49 }
 0x1a4   : > { %1306 = vmatpush.xpose.msk.msra.mxu2 %vm432_vm0, %v1283_v52 }
 0x1a5   : > { %1326 = vmatpush.xpose.msk.msra.mxu3 %vm432_vm0, %v1299_v53 }
 0x1a8   : > { %1307 = vmatpush.xpose.msk.msra.mxu2 %vm432_vm0, %v1282_v54 }
 0x1a9   : > { %1327 = vmatpush.xpose.msk.msra.mxu3 %vm432_vm0, %v1298_v56 }
 0x1ac   : > { %1308 = vmatpush.xpose.msk.msra.mxu2 %vm432_vm0, %v1281_v57  ;;  %v788_v57 = vpop.permute.xlu2 %787 }
 0x1ad   : > { %1328 = vmatpush.xpose.msk.msra.mxu3 %vm432_vm0, %v1297_v58 }
 0x1b0   : > { %1309 = vmatpush.xpose.msk.msra.mxu2 %vm432_vm0, %v1280_v59 }
 0x1b1   : > { %1329 = vmatpush.xpose.msk.msra.mxu3 %vm432_vm0, %v1296_v60  ;;  %v1888_v60 = vperm.slane %v788_v57, 0 }
 0x1b4   : > { %1310 = vmatpush.xpose.msk.msra.mxu2 %vm432_vm0, %v1279_v61 }
 0x1b5   : > { %1330 = vmatpush.xpose.msk.msra.mxu3 %vm432_vm0, %v1295_v63 }
 0x1b8   : > { %1311 = vmatpush.xpose.msk.msra.mxu2 %vm432_vm0, %v1278_v0  ;;  %v799_v0 = vlaneseq }
 0x1b9   : > { %1331 = vmatpush.xpose.msk.msra.mxu3 %vm432_vm0, %v1294_v1 }
 0x1ba   : > { %vm1894_vm4 = vcmp.lt.s32.totalorder %v799_v0, 256 }
 0x1bc   : > { %1312 = vmatpush.xpose.msk.msra.mxu2 %vm432_vm0, %v1277_v2 }
 0x1bd   : > { %1332 = vmatpush.xpose.msk.msra.mxu3 %vm432_vm0, %v1293_v3 }
 0x1c0   : > { %1313 = vmatpush.xpose.msk.msra.mxu2 %vm432_vm0, %v1276_v4 }
 0x1c1   : > { %1333 = vmatpush.xpose.msk.msra.mxu3 %vm432_vm0, %v1292_v5 }
 0x1c4   : > { %1314 = vmatpush.xpose.msk.msra.mxu2 %vm432_vm0, %v1275_v6 }
 0x1c5   : > { %1334 = vmatpush.xpose.msk.msra.mxu3 %vm432_vm0, %v1291_v7 }
 0x1c8   : > { %1315 = vmatpush.xpose.msk.msra.mxu2 %vm432_vm0, %v1274_v8 }
 0x1c9   : > { %1335 = vmatpush.xpose.msk.msra.mxu3 %vm432_vm0, %v1290_v9 }
 0x1cc   : > { %1316 = vmatpush.xpose.msk.msra.mxu2 %vm432_vm0, %v1273_v10 }
 0x1cd   : > { %1336 = vmatpush.xpose.msk.msra.mxu3 %vm432_vm0, %v1289_v11 }
 0x1d0   : > { %1317 = vmatpush.xpose.msk.msra.mxu2 %vm432_vm0, %v1272_v13 }
 0x1d1   : > { %1337 = vmatpush.xpose.msk.msra.mxu3 %vm432_vm0, %v1288_v15 }
 0x1d4   : > { %1318 = vmatpush.xpose.msk.msra.mxu2 %vm432_vm0, %v1271_v17 }
 0x1d5   : > { %1338 = vmatpush.xpose.msk.msra.mxu3 %vm432_vm0, %v1287_v18 }
 0x1d7   : > { %1319 = vmatmul.msk.f32.vlgmr.msra.gmra.mxu2 %vm432_vm0, %v1673_v41 }
 0x1d8   : > { %1339 = vmatmul.msk.f32.vlgmr.msra.gmra.mxu3 %vm432_vm0, %v1673_v41 }
 0x1df   : > { %1320 = vmatmul.msk.f32.gmra.mxu2 %vm432_vm0, %v1685_v43 }
 0x1e0   : > { %1340 = vmatmul.msk.f32.gmra.mxu3 %vm432_vm0, %v1685_v43 }
 0x1e7   : > { %1321 = vmatmul.msk.f32.gmra.mxu2 %vm432_vm0, %v1694_v44 }
 0x1e8   : > { %1341 = vmatmul.msk.f32.gmra.mxu3 %vm432_vm0, %v1694_v44 }
 0x1ef   : > { %1322 = vmatmul.msk.f32.gmra.mxu2 %vm432_vm0, %v1703_v45 }
 0x1f0   : > { %1342 = vmatmul.msk.f32.gmra.mxu3 %vm432_vm0, %v1703_v45 }
 0x21a   : > { %v724_v20 = vpop.f32.mrf.mxu2 }
 0x21b   : > { %v747_v41 = vpop.f32.mrf.mxu3  ;;  %v725_v23 = vadd.f32 %v724_v20, %v1872_v21 }
 0x21c   : > { %v748_v43 = vadd.f32 %v747_v41, %v1872_v21 }
 0x21d   : > { %v753_v27 = vmax.f32 %v725_v23, 0.0 }
 0x21e   : > { %v754_v44 = vmax.f32 %v748_v43, 0.0 }
 0x21f   : > { %v767_v34 = vmul.f32 %v1880_v32, %v753_v27 }
 0x220   : > { %v768_v35 = vmul.f32 %v1880_v32, %v754_v44 }
 0x222   : > { %v727_v25 = vpop.f32.mrf.mxu2 }
 0x223   : > { %v750_v26 = vpop.f32.mrf.mxu3  ;;  %v728_v28 = vadd.f32 %v727_v25, %v1876_v24 }
 0x224   : > { %v751_v30 = vadd.f32 %v750_v26, %v1876_v24 }
 0x225   : > { %v755_v31 = vmax.f32 %v728_v28, 0.0 }
 0x226   : > { %v756_v45 = vmax.f32 %v751_v30, 0.0 }
 0x227   : > { %v769_v36 = vmul.f32 %v1882_v33, %v755_v31 }
 0x228   : > { %v770_v37 = vmul.f32 %v1882_v33, %v756_v45 }
 0x229   : > { %v771_v39 = vadd.f32 %v769_v36, %v767_v34 }
 0x22a   : > { %v778_v40 = vadd.f32 %v770_v37, %v768_v35 }
 0x22b   : > { %v772_v42 = vrot.slane %v771_v39, 4 }
 0x22c   : > { %v779_v46 = vrot.slane %v778_v40, 4 }
 0x22d   : > { %v773_v48 = vadd.f32 %v772_v42, %v771_v39 }
 0x22e   : > { %v780_v49 = vadd.f32 %v779_v46, %v778_v40 }
 0x22f   : > { %v774_v52 = vrot.slane %v773_v48, 2 }
 0x230   : > { %v781_v53 = vrot.slane %v780_v49, 2 }
 0x231   : > { %v775_v54 = vadd.f32 %v774_v52, %v773_v48 }
 0x232   : > { %v782_v56 = vadd.f32 %v781_v53, %v780_v49 }
 0x233   : > { %v776_v58 = vrot.slane %v775_v54, 1 }
 0x234   : > { %v783_v59 = vrot.slane %v782_v56, 1 }
 0x235   : > { %v777_v61 = vadd.f32 %v776_v58, %v775_v54 }
 0x236   : > { %v784_v63 = vadd.f32 %v783_v59, %v782_v56 }
 0x237   : > { %v791_v2 = vadd.f32 %v1888_v60, %v777_v61 }
 0x238   : > { %v792_v1 = vadd.f32 %v1888_v60, %v784_v63 }
 0x23a   : > { %v795_v3 = vrot.slane %v792_v1, 7 }
 0x23c   : > { %v797_v5 = vsel %vm796_vm3, %v791_v2, %v795_v3 }
 0x23d   : > { %803 = vst.msk [vmem:[%s1899_s15] sm:$0x3] %vm1894_vm4, %v797_v5 }
 0x25a   : > { %v950_v6 = vpop.f32.mrf.mxu2 }
 0x25b   : > { %v979_v7 = vpop.f32.mrf.mxu3  ;;  %v951_v27 = vadd.f32 %v950_v6, %v1722_v62 }
 0x25c   : > { %v980_v44 = vadd.f32 %v979_v7, %v1722_v62 }
 0x25d   : > { %v991_v45 = vmax.f32 %v951_v27, 0.0 }
 0x262   : > { %v953_v8 = vpop.f32.mrf.mxu2 }
 0x263   : > { %v982_v9 = vpop.f32.mrf.mxu3  ;;  %v954_v23 = vadd.f32 %v953_v8, %v1711_v51 }
 0x264   : > { %v983_v43 = vadd.f32 %v982_v9, %v1711_v51 }
 0x265   : > { %v993_v31 = vmax.f32 %v954_v23, 0.0 }
 0x26a   : > { %v956_v10 = vpop.f32.mrf.mxu2 }
 0x26b   : > { %v985_v11 = vpop.f32.mrf.mxu3  ;;  %v957_v17 = vadd.f32 %v956_v10, %v1716_v55 }
 0x26c   : > { %v986_v18 = vadd.f32 %v985_v11, %v1716_v55  ;;  %v994_v55 = vmax.f32 %v983_v43, 0.0 }
 0x26d   : > { %v995_v28 = vmax.f32 %v957_v17, 0.0 }
 0x26e   : > { %v996_v30 = vmax.f32 %v986_v18, 0.0 }
 0x272   : > { %v959_v13 = vpop.f32.mrf.mxu2 }
 0x273   : > { %v988_v15 = vpop.f32.mrf.mxu3  ;;  %v960_v20 = vadd.f32 %v959_v13, %v1709_v50 }
 0x274   : > { %v989_v41 = vadd.f32 %v988_v15, %v1709_v50  ;;  %v992_v50 = vmax.f32 %v980_v44, 0.0 }
 0x275   : > { %v997_v25 = vmax.f32 %v960_v20, 0.0 }
 0x276   : > { %v998_v26 = vmax.f32 %v989_v41, 0.0 }
 0x277   : > { %1011 = vmatpush.msrb.mxu0 %v997_v25 }
 0x278   : > { %1037 = vmatpush.msrb.mxu1 %v998_v26 }
 0x279   : > { %1012 = vmatpush.msrb.mxu0 %v995_v28 }
 0x27a   : > { %1038 = vmatpush.msrb.mxu1 %v996_v30 }
 0x27b   : > { %1013 = vmatpush.msrb.mxu0 %v993_v31 }
 0x27c   : > { %1039 = vmatpush.msrb.mxu1 %v994_v55 }
 0x27d   : > { %1014 = vmatpush.msrb.mxu0 %v991_v45 }
 0x27e   : > { %1040 = vmatpush.msrb.mxu1 %v992_v50  ;;  %1343 = vmatmul.msk.f32.vlgmr.msrb.gmra.mxu0 %vm622_vm1, %v1734_v12 }
 0x27f   : > { %1346 = vmatmul.msk.f32.vlgmr.msrb.gmra.mxu1 %vm622_vm1, %v1734_v12 }
 0x286   : > { %1344 = vmatmul.msk.f32.gmra.mxu0 %vm622_vm1, %v1746_v14 }
 0x287   : > { %1347 = vmatmul.msk.f32.gmra.mxu1 %vm622_vm1, %v1746_v14 }
 0x28e   : > { %1345 = vmatmul.msk.f32.gmra.mxu0 %vm622_vm1, %v1755_v16 }
 0x28f   : > { %1348 = vmatmul.msk.f32.gmra.mxu1 %vm622_vm1, %v1755_v16 }
 0x2fb   : > { %v1016_v51 = vpop.f32.mrf.mxu0 }
 0x2fc   : > { %v1042_v62 = vpop.f32.mrf.mxu1  ;;  %v1017_v42 = vadd.f32 %v1016_v51, %v1769_v29 }
 0x2fd   : > { %v1043_v46 = vadd.f32 %v1042_v62, %v1769_v29 }
 0x2fe   : > { %v1051_v53 = vmax.f32 %v1017_v42, 0.0 }
 0x2ff   : > { %v1052_v54 = vmax.f32 %v1043_v46, 0.0 }
 0x303   : > { %v1019_v34 = vpop.f32.mrf.mxu0 }
 0x304   : > { %v1045_v35 = vpop.f32.mrf.mxu1  ;;  %v1020_v12 = vadd.f32 %v1019_v34, %v1763_v22 }
 0x305   : > { %v1046_v39 = vadd.f32 %v1045_v35, %v1763_v22 }
 0x306   : > { %v1053_v49 = vmax.f32 %v1020_v12, 0.0 }
 0x307   : > { %v1054_v52 = vmax.f32 %v1046_v39, 0.0 }
 0x30b   : > { %v1022_v36 = vpop.f32.mrf.mxu0 }
 0x30c   : > { %v1048_v37 = vpop.f32.mrf.mxu1  ;;  %v1023_v40 = vadd.f32 %v1022_v36, %v1761_v19 }
 0x30d   : > { %v1049_v14 = vadd.f32 %v1048_v37, %v1761_v19 }
 0x30e   : > { %v1055_v48 = vmax.f32 %v1023_v40, 0.0 }
 0x30f   : > { %v1056_v16 = vmax.f32 %v1049_v14, 0.0 }
 0x310   : > { %1070 = vmatpush.msra.mxu0 %v1055_v48 }
 0x311   : > { %1093 = vmatpush.msra.mxu1 %v1056_v16 }
 0x312   : > { %1071 = vmatpush.msra.mxu0 %v1053_v49 }
 0x313   : > { %1094 = vmatpush.msra.mxu1 %v1054_v52 }
 0x314   : > { %1072 = vmatpush.msra.mxu0 %v1051_v53 }
 0x315   : > { %1095 = vmatpush.msra.mxu1 %v1052_v54  ;;  %1349 = vmatmul.msk.f32.vlgmr.msra.gmra.mxu0 %vm700_vm2, %v1776_v38 }
 0x316   : > { %1351 = vmatmul.msk.f32.vlgmr.msra.gmra.mxu1 %vm700_vm2, %v1776_v38 }
 0x31d   : > { %1350 = vmatmul.msk.f32.gmra.mxu0 %vm700_vm2, %v1793_v47 }
 0x31e   : > { %1352 = vmatmul.msk.f32.gmra.mxu1 %vm700_vm2, %v1793_v47 }
 0x392   : > { %v1074_v19 = vpop.f32.mrf.mxu0 }
 0x393   : > { %v1097_v22 = vpop.f32.mrf.mxu1  ;;  %v1075_v29 = vadd.f32 %v1074_v19, %v1872_v21 }
 0x394   : > { %v1098_v56 = vadd.f32 %v1097_v22, %v1872_v21 }
 0x395   : > { %v1103_v59 = vmax.f32 %v1075_v29, 0.0 }
 0x396   : > { %v1104_v61 = vmax.f32 %v1098_v56, 0.0 }
 0x397   : > { %v1107_v2 = vmul.f32 %v1103_v59, %v1880_v32 }
 0x398   : > { %v1108_v47 = vmul.f32 %v1104_v61, %v1880_v32 }
 0x39a   : > { %v1077_v57 = vpop.f32.mrf.mxu0 }
 0x39b   : > { %v1100_v58 = vpop.f32.mrf.mxu1  ;;  %v1078_v63 = vadd.f32 %v1077_v57, %v1876_v24 }
 0x39c   : > { %v1101_v38 = vadd.f32 %v1100_v58, %v1876_v24 }
 0x39d   : > { %v1105_v0 = vmax.f32 %v1078_v63, 0.0 }
 0x39e   : > { %v1106_v1 = vmax.f32 %v1101_v38, 0.0 }
 0x39f   : > { %v1109_v3 = vmul.f32 %v1105_v0, %v1882_v33 }
 0x3a0   : > { %v1110_v5 = vmul.f32 %v1106_v1, %v1882_v33 }
 0x3a1   : > { %v1111_v6 = vadd.f32 %v1109_v3, %v1107_v2 }
 0x3a2   : > { %v1118_v21 = vadd.f32 %v1110_v5, %v1108_v47 }
 0x3a3   : > { %v1112_v7 = vrot.slane %v1111_v6, 4 }
 0x3a4   : > { %v1119_v8 = vrot.slane %v1118_v21, 4 }
 0x3a5   : > { %v1113_v9 = vadd.f32 %v1112_v7, %v1111_v6 }
 0x3a6   : > { %v1120_v10 = vadd.f32 %v1119_v8, %v1118_v21 }
 0x3a7   : > { %v1114_v11 = vrot.slane %v1113_v9, 2 }
 0x3a8   : > { %v1121_v24 = vrot.slane %v1120_v10, 2 }
 0x3a9   : > { %v1115_v13 = vadd.f32 %v1114_v11, %v1113_v9 }
 0x3aa   : > { %v1122_v15 = vadd.f32 %v1121_v24, %v1120_v10 }
 0x3ab   : > { %v1116_v17 = vrot.slane %v1115_v13, 1 }
 0x3ac   : > { %v1123_v18 = vrot.slane %v1122_v15, 1 }
 0x3ad   : > { %v1117_v20 = vadd.f32 %v1116_v17, %v1115_v13 }
 0x3ae   : > { %v1124_v32 = vadd.f32 %v1123_v18, %v1122_v15 }
 0x3af   : > { %v1125_v33 = vadd.f32 %v1117_v20, %v1888_v60 }
 0x3b0   : > { %v1126_v41 = vadd.f32 %v1124_v32, %v1888_v60 }
 0x3b1   : > { %1141 = sbr.rel (!%p1569_p5) target bundleno = 980 (0x3d4), region = 60 }
 0x3b2   : > { %v1129_v23 = vrot.slane %v1126_v41, 7 }
 0x3b4   : > { %v1130_v43 = vsel %vm796_vm3, %v1125_v33, %v1129_v23 }
 0x3b5   : > { %1353 = vst.msk [vmem:[%s1899_s15 + $0x2] sm:$0x3] %vm1894_vm4, %v1130_v43 }
 0x3b6   : > { %s2030_s22 = smov (!%p1144_p11, %s1143_s22), 4 }
 0x3b7   : > { %s1146_s23 = ssub.s32 4, %s2030_s22 }
 0x3b8   : > { %s1147_s24 = sshll.u32 %s1146_s23, 4 }
 0x3b9   : > { %1148 = vsyncadd %s1954_s17, %s1147_s24  ;;  %p1356_p12 = scmp.ne.s32.totalorder %s2030_s22, 0  ;;  %s1150_s27 = scalar_lea.hbm %s2016_s9, %s1355_s18 }
 0x3ba   : > { %s2017_s28 = sshll.u32 %s2030_s22, 4  ;;  %s1152_s8 = sshll.u32 %s1899_s15, 4  ;;  %s1969_s8 = int_to_ptr.vmem [resolvable:$true] %s1152_s8 }
 0x3bb   : > { %s1154_s29 = sshll.u32 %s1150_s27, 4  ;;  %s1401_s30 = sshra.s32 %s1969_s8, 4  ;;  %s1155_s29 = int_to_ptr.hbm [resolvable:$true] %s1154_s29  ;;  %s1402_s30 = int_to_ptr.vmem [resolvable:$true] %s1401_s30 }
 0x3bc   : > { %s1403_s10 = sshrl.u32 %s2017_s28, 4  ;;  %s1477_s23 = smov [#allocation3]  }
 0x3bd   : > { %s1408_s26 = scalar_lea.vmem %s1402_s30, %s1403_s10  ;;  %s1412_s24 = scalar_lea.vmem %s1477_s23, 8 }
 0x3be   : > { %p1409_p13 = scmp.ne.s32.totalorder %s1402_s30, %s1408_s26  ;;  %p1414_p2 = scmp.lt.s32.totalorder %s1412_s24, %s1408_s26 }
 0x3c0   : > { %p1410_p0 = pnand %p1409_p13, %p1356_p12 }
 0x3c2   : > { %p1411_p1 = pneg %p1410_p0 }
 0x3c4   : > { %p1416_p3 = pnand %p1414_p2, %p1411_p1 }
 0x3c6   : > { %1419 = shalt.err (!%p1416_p3)
}
 0x3c7   : > { %s1420_s15 = sshra.s32 %s1155_s29, 4  ;;  %s1431_s27 = scalar_lea.hbm %s2016_s9, 10  ;;  %s1421_s15 = int_to_ptr.hbm [resolvable:$true] %s1420_s15 }
 0x3c8   : > { %s1427_s18 = scalar_lea.hbm %s1421_s15, %s1403_s10  ;;  %p1432_p8 = scmp.lt.s32.totalorder %s1421_s15, %s2016_s9 }
 0x3c9   : > { %p1428_p4 = scmp.ne.s32.totalorder %s1421_s15, %s1427_s18  ;;  %p1433_p9 = scmp.lt.s32.totalorder %s1431_s27, %s1427_s18 }
 0x3cb   : > { %p1429_p5 = pnand %p1428_p4, %p1356_p12  ;;  %p1434_p10 = por %p1433_p9, %p1432_p8 }
 0x3cd   : > { %p1430_p7 = pneg %p1429_p5 }
 0x3cf   : > { %p1435_p11 = pnand %p1434_p10, %p1430_p7 }
 0x3d1   : > { %1438 = shalt.err (!%p1435_p11)
}
 0x3d2   : > { %s2022_s10 = sshll.u32 %s2030_s22, 4 }
 0x3d3   : > { %1157 = dma.vmem_to_hbm [thread:$0]  (%p1356_p12), %s1969_s8, %s2022_s10, %s1155_s29, %s1954_s17  }
 0x3d4 PF: > { %p1364_p13 = scmp.ge.s32.totalorder %s1474_s14, 2  ;;  %s1166_s26 = sand.u32 1, %s1462_s11  }
 0x3d5   : > { %s1167_s28 = scalar_lea.sflag [#allocation4], %s1166_s26 }
 0x3d6   : > { %p1361_p0 = pnand %p1364_p13, %p1573_p6 }
 0x3d8   : > { %p1362_p1 = pneg %p1361_p0 }
 0x3da   : > { %1457 = dma.done.wait (%p1362_p1), %s1167_s28, 64  }
 0x3db   : > { %1459 = vsyncadd (%p1362_p1), %s1167_s28, 4294967232  ;;  %p21_p2 = scmp.ge.s32.totalorder %s1556_s16, 5   ;;  %s2023_s11 = smov %s1466_s12 }
 0x3dc   : > { %s2024_s12 = smov %s1470_s13  ;;  %s2025_s13 = smov %s1567_s19 }
 0x3dd   : > { %s2026_s14 = smov %s1556_s16  ;;  %23 = sbr.rel (!%p21_p2) target bundleno = 6 (0x6), region = 93 }
 0x3e2   :  { %1173 = vsyncpa [#allocation4], 1 }
 0x3e3   :  { %1175 = vsyncpa [#allocation4 + $0x1], 1 }

</bundles_post_ra>
